<compile_context>
chip_gen: v7x
topology: tpu7x:2x2x1
jax: 0.10.0
libtpu: 0.0.40
codegen_flags: <defaults>
</compile_context>

<pallas_src>
import functools

import jax
import jax.numpy as jnp
from jax.experimental import pallas as pl
from jax.experimental.pallas import tpu as pltpu


def _noise_add_tpu_kernel(seed_ref, x_ref, o_ref, *, stddev, compute_dtype):
    # Per-tile seeding: mix the user seed with the grid position so every tile
    # (and every TensorCore shard on megacore parts) draws an independent
    # stream instead of replaying the same noise.
    pltpu.prng_seed(seed_ref[0], pl.program_id(0))
    noise = pltpu.stateful_normal(x_ref.shape, compute_dtype)
    x = x_ref[...].astype(compute_dtype)
    o_ref[...] = (x + noise * jnp.asarray(stddev, compute_dtype)).astype(o_ref.dtype)


def _noise_add_portable_kernel(x_ref, n_ref, o_ref, *, stddev):
    # Fallback (non-TPU backends / interpret testing): noise is generated
    # outside the kernel; the kernel fuses the scale-and-add.
    o_ref[...] = (x_ref[...].astype(jnp.float32)
                  + n_ref[...].astype(jnp.float32) * stddev).astype(o_ref.dtype)


def _pick_lane(n):
    """Largest lane width (multiple of 128) that divides n; pad only if none."""
    for lane in (1024, 512, 256, 128):
        if n % lane == 0:
            return lane, False
    return 128, True


def _select_tiling(lane, itemsize):
    """Per-generation (tile_rows, vmem_limit_bytes).

    128 MiB-VMEM parts (v5e/v6e): 16 MiB tiles, 96 MiB limit.
    64 MiB-VMEM parts (v7x) / unknown: 8 MiB tiles, 48 MiB limit
    (in+out double buffering = 32 MiB, under the 64 MiB physical ceiling).
    Oversized tiles on v5e buy little but cost nothing (128 MiB VMEM).
    """
    tile_bytes = 8 * 1024 * 1024
    vmem_limit = 48 * 1024 * 1024
    try:
        info = pltpu.get_tpu_info()
        vmem_cap = int(getattr(info, "vmem_capacity_bytes", 64 * 1024 * 1024))
        if vmem_cap >= 100 * 1024 * 1024:
            tile_bytes = 16 * 1024 * 1024
            vmem_limit = 96 * 1024 * 1024
    except Exception:
        pass  # conservative defaults above are safe on every generation
    tile_rows = max(8, (tile_bytes // (lane * itemsize)) // 8 * 8)
    return tile_rows, vmem_limit


def _gaussian_noise_impl(x, seed, *, stddev=0.1, training=True, in_place=False):
    """JAX/Pallas equivalent of GaussianNoise.forward.

    x:        any-shaped float array (e.g. NCHW activations)
    seed:     int seeding the noise stream (advance per training step!)
    in_place: if True and the caller donates x, the noise is added in place
              (input_output_aliases on the pallas_call).
    """
    if not training:
        # Eval mode: identity, exactly as the PyTorch module.
        return x

    orig_shape = x.shape
    orig_dtype = x.dtype
    # bf16 fast path on bf16 activations (half the vreg pressure, bf16 EUP on
    # v6e/v7x); everything else computes in f32.
    compute_dtype = jnp.bfloat16 if x.dtype == jnp.bfloat16 else jnp.float32

    # Flatten to a lane-dense (rows, lane) slab.  Padding only triggers when
    # the element count is not a multiple of 128 (rare for NN activations).
    n = x.size
    lane, needs_pad = _pick_lane(n)
    flat = x.reshape(-1)
    if needs_pad:
        n_slab = int(pl.cdiv(n, lane)) * lane
        flat = jnp.pad(flat, (0, n_slab - n))
    else:
        n_slab = n
    rows = n_slab // lane
    x2 = flat.reshape(rows, lane)

    # Tile rows: either the full extent (small inputs) or a multiple of 8.
    # Ragged last row-blocks are handled by Pallas (padded reads, masked
    # writeback).
    tile_rows, vmem_limit = _select_tiling(lane, x2.dtype.itemsize)
    tile_rows = min(tile_rows, rows)
    grid = (int(pl.cdiv(rows, tile_rows)),)
    block = pl.BlockSpec((tile_rows, lane), lambda i: (i, 0))

    on_tpu = jax.default_backend() == "tpu"

    compiler_params = pltpu.CompilerParams(
        # "parallel": no cross-iteration state -> megacore sharding across
        # TensorCores on multi-core parts (v7x).
        dimension_semantics=("parallel",),
        vmem_limit_bytes=vmem_limit,
    )
    cost = pl.CostEstimate(
        flops=2 * n_slab,                                        # scale + add
        transcendentals=(3 * n_slab) if on_tpu else 0,           # normal draw
        bytes_accessed=(2 if on_tpu else 3) * n_slab * x2.dtype.itemsize,
    )
    kwargs = dict(
        out_shape=jax.ShapeDtypeStruct(x2.shape, x2.dtype),
        grid=grid,
        out_specs=block,
        compiler_params=compiler_params,
        cost_estimate=cost,
    )

    if on_tpu:
        # In-kernel hardware PRNG: only x is read from HBM, only out written.
        if in_place:
            kwargs["input_output_aliases"] = {1: 0}   # x (operand 1) -> out 0
        seed_arr = jnp.full((1,), seed, dtype=jnp.int32)
        out2 = pl.pallas_call(
            functools.partial(_noise_add_tpu_kernel, stddev=float(stddev),
                              compute_dtype=compute_dtype),
            in_specs=[
                pl.BlockSpec(memory_space=pltpu.MemorySpace.SMEM),  # seed
                block,                                              # x tile
            ],
            **kwargs,
        )(seed_arr, x2)
    else:
        # Portable path (CPU / interpret): pltpu.prng_* has no lowering here.
        noise = jax.random.normal(jax.random.PRNGKey(seed), x2.shape,
                                  dtype=jnp.float32)
        if in_place:
            kwargs["input_output_aliases"] = {0: 0}
        out2 = pl.pallas_call(
            functools.partial(_noise_add_portable_kernel, stddev=float(stddev)),
            in_specs=[block, block],
            **kwargs,
        )(x2, noise)

    out_flat = out2.reshape(-1)
    if needs_pad:
        out_flat = out_flat[:n]
    return out_flat.reshape(orig_shape).astype(orig_dtype)


# Jit the whole wrapper so reshapes are metadata-only and per-op dispatch
# overhead disappears for small activations.
gaussian_noise = jax.jit(
    _gaussian_noise_impl, static_argnames=("stddev", "training", "in_place"))


if __name__ == "__main__":
    key = jax.random.PRNGKey(0)
    # Small NCHW input consistent with how the module is used on conv features.
    B, C, H, W = 2, 4, 16, 16
    x = jax.random.normal(key, (B, C, H, W), dtype=jnp.float32)

    stddev = 0.1
    y_train = gaussian_noise(x, seed=0, stddev=stddev, training=True)
    y_eval = gaussian_noise(x, seed=0, stddev=stddev, training=False)
    jax.block_until_ready(y_train)
    jax.block_until_ready(y_eval)

    # Sanity checks: eval mode is identity; training mode adds small-magnitude
    # noise (statistics only — the draw itself is the kernel / HW PRNG).
    assert y_train.shape == x.shape and y_train.dtype == x.dtype
    assert bool(jnp.all(y_eval == x))
    resid = y_train - x
    assert float(jnp.max(jnp.abs(resid))) > 0.0      # noise was actually added
    assert float(jnp.std(resid)) < 5.0 * stddev      # roughly stddev-scaled
    assert bool(jnp.all(jnp.isfinite(y_train)))

    # Ragged-size input (210 elements, not a multiple of 128) exercises the
    # adaptive-lane + padded-tail path.
    x_odd = jax.random.normal(jax.random.PRNGKey(1), (2, 3, 5, 7),
                              dtype=jnp.float32)
    y_odd = gaussian_noise(x_odd, seed=7, stddev=stddev, training=True)
    jax.block_until_ready(y_odd)
    assert y_odd.shape == x_odd.shape and y_odd.dtype == x_odd.dtype
    resid_odd = y_odd - x_odd
    assert float(jnp.max(jnp.abs(resid_odd))) > 0.0
    assert bool(jnp.all(jnp.isfinite(y_odd)))

    print("KERNEL_OK")
</pallas_src>

<mosaic_0001>
module attributes {stable_mosaic.version = 11 : i64} {
  func.func @_noise_add_portable_kernel(%arg0: i32, %arg1: memref<2x1024xf32, #tpu.memory_space<vmem>>, %arg2: memref<2x1024xf32, #tpu.memory_space<vmem>>, %arg3: memref<2x1024xf32, #tpu.memory_space<vmem>>) attributes {dimension_semantics = [#tpu.dimension_semantics<parallel>], iteration_bounds = array<i64: 1>, scalar_prefetch = 0 : i64, scratch_operands = 0 : i64, tpu.core_type = #tpu.core_type<tc>, window_params = [{transform_indices = @transform_0, window_bounds = array<i64: 2, 1024>}, {transform_indices = @transform_1, window_bounds = array<i64: 2, 1024>}, {transform_indices = @transform_2, window_bounds = array<i64: 2, 1024>}]} {
    %c0 = arith.constant 0 : index
    %c0_0 = arith.constant 0 : index
    %0 = vector.load %arg1[%c0, %c0_0] : memref<2x1024xf32, #tpu.memory_space<vmem>>, vector<2x1024xf32>
    %c0_1 = arith.constant 0 : index
    %c0_2 = arith.constant 0 : index
    %1 = vector.load %arg2[%c0_1, %c0_2] : memref<2x1024xf32, #tpu.memory_space<vmem>>, vector<2x1024xf32>
    %cst = arith.constant 1.000000e-01 : f32
    %2 = vector.broadcast %cst : f32 to vector<2x1024xf32>
    %3 = arith.mulf %1, %2 : vector<2x1024xf32>
    %4 = arith.addf %0, %3 : vector<2x1024xf32>
    %c0_3 = arith.constant 0 : index
    %c0_4 = arith.constant 0 : index
    %5 = vector.load %arg3[%c0_3, %c0_4] : memref<2x1024xf32, #tpu.memory_space<vmem>>, vector<2x1024xf32>
    tpu.vector_store %arg3[%c0_3, %c0_4], %4 {strides = array<i32>} : memref<2x1024xf32, #tpu.memory_space<vmem>>, vector<2x1024xf32>,
    return
  }
  func.func @transform_0(%arg0: i32) -> (i32, i32) {
    %c0_i32 = arith.constant 0 : i32
    %c0_i32_0 = arith.constant 0 : i32
    return %arg0, %c0_i32 : i32, i32
  }
  func.func @transform_1(%arg0: i32) -> (i32, i32) {
    %c0_i32 = arith.constant 0 : i32
    %c0_i32_0 = arith.constant 0 : i32
    return %arg0, %c0_i32 : i32, i32
  }
  func.func @transform_2(%arg0: i32) -> (i32, i32) {
    %c0_i32 = arith.constant 0 : i32
    %c0_i32_0 = arith.constant 0 : i32
    return %arg0, %c0_i32 : i32, i32
  }
}

</mosaic_0001>

<bundles_post_ra>
// kernel: _gaussian_noise_impl.1
= control target key start
LH: loop header
LB: loop body
LE: loop exit
PB: predicated region body
PF: predicated region fallthrough
CT: control target
= control target key end

     0   :  { %s58_s0 = inlined_call_operand.vmem [shape: f32[2,1024], index: 0, kind: input, shape index: {}]   ;;  %s59_s1 = inlined_call_operand.vmem [shape: f32[2,1024], index: 1, kind: input, shape index: {}]   ;;  %s60_s2 = inlined_call_operand.vmem [shape: f32[2,1024], index: 2, kind: output, shape index: {}]  }
   0x1   :  { %v11_v0 = vld [vmem:[%s58_s0] sm:$0xff]  ;;  %v12_v3 = vld [vmem:[%s58_s0 + $0x8] sm:$0xff] }
   0x2   :  { %v13_v1 = vld [vmem:[%s59_s1] sm:$0xff]  ;;  %v14_v4 = vld [vmem:[%s59_s1 + $0x8] sm:$0xff] }
   0x3   :  { %v15_v2 = vmul.f32 0.1, %v13_v1  ;;  %v16_v5 = vmul.f32 0.1, %v14_v4 }
   0x5   :  { %v17_v6 = vadd.f32 %v15_v2, %v11_v0  ;;  %v18_v7 = vadd.f32 %v16_v5, %v12_v3 }
   0x7   :  { %19 = vst [vmem:[%s60_s2] sm:$0xff] %v17_v6  ;;  %20 = vst [vmem:[%s60_s2 + $0x8] sm:$0xff] %v18_v7 }

</bundles_post_ra>
